<compile_context>
chip_gen: v6e
topology: v6e:2x2x1
jax: 0.10.0
libtpu: 0.0.40
codegen_flags: <defaults>
</compile_context>

<pallas_src>
import jax
import jax.numpy as jnp
from jax.experimental import pallas as pl
from jax.experimental.pallas import tpu as pltpu


def _round_up(x, m):
    return (x + m - 1) // m * m


def _hardswish(x):
    # PyTorch nn.Hardswish: x * clamp(x + 3, 0, 6) / 6
    return x * jnp.clip(x + 3.0, 0.0, 6.0) * (1.0 / 6.0)


def actor_mlp_kernel(x_ref, w1_ref, w23_ref, w4_ref, b123_ref, b4_ref, o_ref):
    """x_ref:   [TB, state_dim] f32 tile (pipelined over the batch grid)
    w1_ref:  [state_dim, F]   bf16 (resident)
    w23_ref: [2, F, F]        bf16 (resident)
    w4_ref:  [F, A_pad]       bf16 (resident)
    b123_ref:[3, F]           f32  (resident)
    b4_ref:  [1, A_pad]       f32  (resident)
    o_ref:   [TB, A_pad]      f32  (lane-dense; real columns sliced by wrapper)
    """
    cdt = w1_ref.dtype
    x = x_ref[...].astype(cdt)

    # Layer 1: Linear + ReLU (bf16 MXU inputs, f32 accumulate + f32 elementwise)
    h = jnp.dot(x, w1_ref[...], preferred_element_type=jnp.float32) + b123_ref[0:1, :]
    h = jnp.maximum(h, 0.0)

    # Layer 2: Linear + ReLU
    h = jnp.dot(h.astype(cdt), w23_ref[0], preferred_element_type=jnp.float32) + b123_ref[1:2, :]
    h = jnp.maximum(h, 0.0)

    # Layer 3: Linear + Hardswish
    h = jnp.dot(h.astype(cdt), w23_ref[1], preferred_element_type=jnp.float32) + b123_ref[2:3, :]
    h = _hardswish(h)

    # Layer 4: Linear + tanh
    h = jnp.dot(h.astype(cdt), w4_ref[...], preferred_element_type=jnp.float32) + b4_ref[...]
    o_ref[...] = jnp.tanh(h).astype(o_ref.dtype)


def pack_params(params, compute_dtype=jnp.bfloat16):
    """Pad + pack weights/biases once (call when params change, not per step)."""
    (w1, b1), (w2, b2), (w3, b3), (w4, b4) = params
    state_dim, mid_dim = w1.shape
    action_dim = w4.shape[1]
    F = _round_up(mid_dim, 128)          # padded hidden width
    A_pad = _round_up(action_dim, 128)   # padded (lane-dense) output width

    def pad_w(w, rows, cols):
        buf = jnp.zeros((rows, cols), compute_dtype)
        return buf.at[: w.shape[0], : w.shape[1]].set(w.astype(compute_dtype))

    def pad_b(b, cols):
        b = b.reshape(-1)
        return jnp.zeros((cols,), jnp.float32).at[: b.shape[0]].set(b.astype(jnp.float32))

    return dict(
        w1=pad_w(w1, state_dim, F),
        w23=jnp.stack([pad_w(w2, F, F), pad_w(w3, F, F)]),
        w4=pad_w(w4, F, A_pad),
        b123=jnp.stack([pad_b(b1, F), pad_b(b2, F), pad_b(b3, F)]),
        b4=pad_b(b4, A_pad).reshape(1, A_pad),
        state_dim=state_dim,
        action_dim=action_dim,
        F=F,
        A_pad=A_pad,
    )


def actor_forward(state, packed, *, block_b=1024):
    """state: [B, state_dim] float32; packed: output of pack_params."""
    B, state_dim = state.shape
    assert state_dim == packed["state_dim"]
    F, A_pad = packed["F"], packed["A_pad"]
    action_dim = packed["action_dim"]

    # --- Batch tiling -------------------------------------------------------
    TB = min(block_b, _round_up(B, 8))               # sublane-aligned batch tile
    if B > 8:
        # Prefer >= 2 grid steps so v7x's second TensorCore gets half the rows
        # (the grid axis is "parallel"); harmless on 1-TC v5e/v6e.
        TB = min(TB, _round_up(-(-B // 2), 8))
    Bp = _round_up(B, TB)

    x = state
    if Bp != B:
        x = jnp.zeros((Bp, state_dim), state.dtype).at[:B].set(state)

    grid = (Bp // TB,)

    # --- VMEM budget (double-buffered IO tiles + double-provisioned weights
    # + f32 intermediate headroom), capped below v7x's 64 MiB physical VMEM.
    weight_bytes = (state_dim * F + 2 * F * F + F * A_pad) * 2 + (3 * F + A_pad) * 4
    io_bytes = 2 * TB * state_dim * 4 + 2 * TB * A_pad * 4
    interm_bytes = 4 * TB * F * 4
    vmem_limit = int(min(max(2 * weight_bytes + io_bytes + interm_bytes,
                             32 * 1024 * 1024), 60 * 1024 * 1024))

    flops = 2 * Bp * (state_dim * F + 2 * F * F + F * A_pad)
    bytes_accessed = Bp * state_dim * 4 + Bp * A_pad * 4 + weight_bytes

    out = pl.pallas_call(
        actor_mlp_kernel,
        out_shape=jax.ShapeDtypeStruct((Bp, A_pad), jnp.float32),
        grid=grid,
        in_specs=[
            pl.BlockSpec((TB, state_dim), lambda i: (i, 0)),   # state tile (pipelined)
            pl.BlockSpec((state_dim, F), lambda i: (0, 0)),    # w1   (resident)
            pl.BlockSpec((2, F, F), lambda i: (0, 0, 0)),      # w2,w3 (resident)
            pl.BlockSpec((F, A_pad), lambda i: (0, 0)),        # w4   (resident)
            pl.BlockSpec((3, F), lambda i: (0, 0)),            # b1..b3 (resident)
            pl.BlockSpec((1, A_pad), lambda i: (0, 0)),        # b4   (resident)
        ],
        out_specs=pl.BlockSpec((TB, A_pad), lambda i: (i, 0)), # lane-dense output
        compiler_params=pltpu.CompilerParams(
            dimension_semantics=("parallel",),                 # shard batch across TCs
            vmem_limit_bytes=vmem_limit,
        ),
        cost_estimate=pl.CostEstimate(
            flops=flops,
            transcendentals=Bp * A_pad,
            bytes_accessed=bytes_accessed,
        ),
    )(x, packed["w1"], packed["w23"], packed["w4"], packed["b123"], packed["b4"])

    return out[:B, :action_dim]


def init_params(key, state_dim, mid_dim, action_dim):
    """Deterministic Kaiming-uniform-ish init; weights stored [in, out]."""
    dims = [(state_dim, mid_dim), (mid_dim, mid_dim),
            (mid_dim, mid_dim), (mid_dim, action_dim)]
    params = []
    for i, (din, dout) in enumerate(dims):
        kw, kb = jax.random.split(jax.random.fold_in(key, i))
        bound = 1.0 / jnp.sqrt(din)
        w = jax.random.uniform(kw, (din, dout), jnp.float32, -bound, bound)
        b = jax.random.uniform(kb, (1, dout), jnp.float32, -bound, bound)
        params.append((w, b))
    return params


def actor_forward_ref(state, params):
    """Plain-JAX f32 reference of the same forward pass."""
    (w1, b1), (w2, b2), (w3, b3), (w4, b4) = params
    h = jnp.maximum(state @ w1 + b1, 0.0)
    h = jnp.maximum(h @ w2 + b2, 0.0)
    h = _hardswish(h @ w3 + b3)
    return jnp.tanh(h @ w4 + b4)


if __name__ == "__main__":
    key = jax.random.PRNGKey(0)
    B, state_dim, mid_dim, action_dim = 8, 16, 32, 4

    k_state, k_param = jax.random.split(key)
    state = jax.random.normal(k_state, (B, state_dim), jnp.float32)
    params = init_params(k_param, state_dim, mid_dim, action_dim)

    packed = pack_params(params)               # hoisted out of the hot path
    out = actor_forward(state, packed)
    out = jax.block_until_ready(out)

    ref = actor_forward_ref(state, params)
    assert out.shape == (B, action_dim)
    # bf16 matmul inputs (f32 accumulate) vs. f32 reference -> loosened tolerance.
    assert jnp.allclose(out, ref, atol=3e-2, rtol=0.0), (
        float(jnp.max(jnp.abs(out - ref))))

    # TODO(synk): `get_action` (tanh output + clipped Gaussian noise) could be
    # fused in-kernel with pltpu.prng_seed / pltpu.stateful_normal, but it is
    # not part of forward() and is left out here.
    print("KERNEL_OK")
</pallas_src>

<mosaic_0001>
module attributes {stable_mosaic.version = 11 : i64} {
  func.func @actor_mlp_kernel(%arg0: i32, %arg1: memref<8x16xf32, #tpu.memory_space<vmem>>, %arg2: memref<16x128xbf16, #tpu.memory_space<vmem>>, %arg3: memref<2x128x128xbf16, #tpu.memory_space<vmem>>, %arg4: memref<128x128xbf16, #tpu.memory_space<vmem>>, %arg5: memref<3x128xf32, #tpu.memory_space<vmem>>, %arg6: memref<1x128xf32, #tpu.memory_space<vmem>>, %arg7: memref<8x128xf32, #tpu.memory_space<vmem>>) attributes {dimension_semantics = [#tpu.dimension_semantics<parallel>], iteration_bounds = array<i64: 1>, scalar_prefetch = 0 : i64, scratch_operands = 0 : i64, tpu.core_type = #tpu.core_type<tc>, window_params = [{transform_indices = @transform_0, window_bounds = array<i64: 8, 16>}, {pipeline_mode = #tpu.pipeline_mode<synchronous>, transform_indices = @transform_1, window_bounds = array<i64: 16, 128>}, {pipeline_mode = #tpu.pipeline_mode<synchronous>, transform_indices = @transform_2, window_bounds = array<i64: 2, 128, 128>}, {pipeline_mode = #tpu.pipeline_mode<synchronous>, transform_indices = @transform_3, window_bounds = array<i64: 128, 128>}, {pipeline_mode = #tpu.pipeline_mode<synchronous>, transform_indices = @transform_4, window_bounds = array<i64: 3, 128>}, {pipeline_mode = #tpu.pipeline_mode<synchronous>, transform_indices = @transform_5, window_bounds = array<i64: 1, 128>}, {transform_indices = @transform_6, window_bounds = array<i64: 8, 128>}]} {
    %c0 = arith.constant 0 : index
    %c0_0 = arith.constant 0 : index
    %0 = vector.load %arg1[%c0, %c0_0] : memref<8x16xf32, #tpu.memory_space<vmem>>, vector<8x16xf32>
    %1 = arith.truncf %0 : vector<8x16xf32> to vector<8x16xbf16>
    %c0_1 = arith.constant 0 : index
    %c0_2 = arith.constant 0 : index
    %2 = vector.load %arg2[%c0_1, %c0_2] : memref<16x128xbf16, #tpu.memory_space<vmem>>, vector<16x128xbf16>
    %cst = arith.constant dense<0.000000e+00> : vector<8x128xf32>
    %3 = tpu.matmul %1, %2, %cst {dimension_numbers = #tpu.dot_dimension_numbers<[1], [0], [0], [1], [0, 0, 1, 1], [], []>} : vector<8x16xbf16>, vector<16x128xbf16>, vector<8x128xf32> -> vector<8x128xf32>
    %c0_3 = arith.constant 0 : index
    %c0_4 = arith.constant 0 : index
    %4 = vector.load %arg5[%c0_3, %c0_4] : memref<3x128xf32, #tpu.memory_space<vmem>>, vector<1x128xf32>
    %5 = vector.broadcast %4 : vector<1x128xf32> to vector<8x128xf32>
    %6 = arith.addf %3, %5 : vector<8x128xf32>
    %cst_5 = arith.constant 0.000000e+00 : f32
    %7 = vector.broadcast %cst_5 : f32 to vector<8x128xf32>
    %8 = arith.maximumf %6, %7 : vector<8x128xf32>
    %9 = arith.truncf %8 : vector<8x128xf32> to vector<8x128xbf16>
    %c0_6 = arith.constant 0 : index
    %c0_7 = arith.constant 0 : index
    %c0_8 = arith.constant 0 : index
    %10 = vector.load %arg3[%c0_6, %c0_7, %c0_8] : memref<2x128x128xbf16, #tpu.memory_space<vmem>>, vector<1x128x128xbf16>
    %11 = vector.shape_cast %10 : vector<1x128x128xbf16> to vector<128x128xbf16>
    %cst_9 = arith.constant dense<0.000000e+00> : vector<8x128xf32>
    %12 = tpu.matmul %9, %11, %cst_9 {dimension_numbers = #tpu.dot_dimension_numbers<[1], [0], [0], [1], [0, 0, 1, 1], [], []>} : vector<8x128xbf16>, vector<128x128xbf16>, vector<8x128xf32> -> vector<8x128xf32>
    %c1 = arith.constant 1 : index
    %c0_10 = arith.constant 0 : index
    %13 = vector.load %arg5[%c1, %c0_10] : memref<3x128xf32, #tpu.memory_space<vmem>>, vector<1x128xf32>
    %14 = vector.broadcast %13 : vector<1x128xf32> to vector<8x128xf32>
    %15 = arith.addf %12, %14 : vector<8x128xf32>
    %cst_11 = arith.constant 0.000000e+00 : f32
    %16 = vector.broadcast %cst_11 : f32 to vector<8x128xf32>
    %17 = arith.maximumf %15, %16 : vector<8x128xf32>
    %18 = arith.truncf %17 : vector<8x128xf32> to vector<8x128xbf16>
    %c1_12 = arith.constant 1 : index
    %c0_13 = arith.constant 0 : index
    %c0_14 = arith.constant 0 : index
    %19 = vector.load %arg3[%c1_12, %c0_13, %c0_14] : memref<2x128x128xbf16, #tpu.memory_space<vmem>>, vector<1x128x128xbf16>
    %20 = vector.shape_cast %19 : vector<1x128x128xbf16> to vector<128x128xbf16>
    %cst_15 = arith.constant dense<0.000000e+00> : vector<8x128xf32>
    %21 = tpu.matmul %18, %20, %cst_15 {dimension_numbers = #tpu.dot_dimension_numbers<[1], [0], [0], [1], [0, 0, 1, 1], [], []>} : vector<8x128xbf16>, vector<128x128xbf16>, vector<8x128xf32> -> vector<8x128xf32>
    %c2 = arith.constant 2 : index
    %c0_16 = arith.constant 0 : index
    %22 = vector.load %arg5[%c2, %c0_16] : memref<3x128xf32, #tpu.memory_space<vmem>>, vector<1x128xf32>
    %23 = vector.broadcast %22 : vector<1x128xf32> to vector<8x128xf32>
    %24 = arith.addf %21, %23 : vector<8x128xf32>
    %cst_17 = arith.constant 3.000000e+00 : f32
    %25 = vector.broadcast %cst_17 : f32 to vector<8x128xf32>
    %26 = arith.addf %24, %25 : vector<8x128xf32>
    %cst_18 = arith.constant 0.000000e+00 : f32
    %cst_19 = arith.constant 6.000000e+00 : f32
    %27 = vector.broadcast %cst_18 : f32 to vector<8x128xf32>
    %28 = arith.maximumf %27, %26 : vector<8x128xf32>
    %29 = vector.broadcast %cst_19 : f32 to vector<8x128xf32>
    %30 = arith.minimumf %29, %28 : vector<8x128xf32>
    %31 = arith.mulf %24, %30 : vector<8x128xf32>
    %cst_20 = arith.constant 0.166666672 : f32
    %32 = vector.broadcast %cst_20 : f32 to vector<8x128xf32>
    %33 = arith.mulf %31, %32 : vector<8x128xf32>
    %34 = arith.truncf %33 : vector<8x128xf32> to vector<8x128xbf16>
    %c0_21 = arith.constant 0 : index
    %c0_22 = arith.constant 0 : index
    %35 = vector.load %arg4[%c0_21, %c0_22] : memref<128x128xbf16, #tpu.memory_space<vmem>>, vector<128x128xbf16>
    %cst_23 = arith.constant dense<0.000000e+00> : vector<8x128xf32>
    %36 = tpu.matmul %34, %35, %cst_23 {dimension_numbers = #tpu.dot_dimension_numbers<[1], [0], [0], [1], [0, 0, 1, 1], [], []>} : vector<8x128xbf16>, vector<128x128xbf16>, vector<8x128xf32> -> vector<8x128xf32>
    %c0_24 = arith.constant 0 : index
    %c0_25 = arith.constant 0 : index
    %37 = vector.load %arg6[%c0_24, %c0_25] : memref<1x128xf32, #tpu.memory_space<vmem>>, vector<1x128xf32>
    %38 = vector.broadcast %37 : vector<1x128xf32> to vector<8x128xf32>
    %39 = arith.addf %36, %38 : vector<8x128xf32>
    %40 = math.tanh %39 : vector<8x128xf32>
    %c0_26 = arith.constant 0 : index
    %c0_27 = arith.constant 0 : index
    %41 = vector.load %arg7[%c0_26, %c0_27] : memref<8x128xf32, #tpu.memory_space<vmem>>, vector<8x128xf32>
    tpu.vector_store %arg7[%c0_26, %c0_27], %40 {strides = array<i32>} : memref<8x128xf32, #tpu.memory_space<vmem>>, vector<8x128xf32>,
    return
  }
  func.func @transform_0(%arg0: i32) -> (i32, i32) {
    %c0_i32 = arith.constant 0 : i32
    %c0_i32_0 = arith.constant 0 : i32
    return %arg0, %c0_i32 : i32, i32
  }
  func.func @transform_1(%arg0: i32) -> (i32, i32) {
    %c0_i32 = arith.constant 0 : i32
    %c0_i32_0 = arith.constant 0 : i32
    %c0_i32_1 = arith.constant 0 : i32
    return %c0_i32, %c0_i32_0 : i32, i32
  }
  func.func @transform_2(%arg0: i32) -> (i32, i32, i32) {
    %c0_i32 = arith.constant 0 : i32
    %c0_i32_0 = arith.constant 0 : i32
    %c0_i32_1 = arith.constant 0 : i32
    %c0_i32_2 = arith.constant 0 : i32
    return %c0_i32, %c0_i32_0, %c0_i32_1 : i32, i32, i32
  }
  func.func @transform_3(%arg0: i32) -> (i32, i32) {
    %c0_i32 = arith.constant 0 : i32
    %c0_i32_0 = arith.constant 0 : i32
    %c0_i32_1 = arith.constant 0 : i32
    return %c0_i32, %c0_i32_0 : i32, i32
  }
  func.func @transform_4(%arg0: i32) -> (i32, i32) {
    %c0_i32 = arith.constant 0 : i32
    %c0_i32_0 = arith.constant 0 : i32
    %c0_i32_1 = arith.constant 0 : i32
    return %c0_i32, %c0_i32_0 : i32, i32
  }
  func.func @transform_5(%arg0: i32) -> (i32, i32) {
    %c0_i32 = arith.constant 0 : i32
    %c0_i32_0 = arith.constant 0 : i32
    %c0_i32_1 = arith.constant 0 : i32
    return %c0_i32, %c0_i32_0 : i32, i32
  }
  func.func @transform_6(%arg0: i32) -> (i32, i32) {
    %c0_i32 = arith.constant 0 : i32
    %c0_i32_0 = arith.constant 0 : i32
    return %arg0, %c0_i32 : i32, i32
  }
}

</mosaic_0001>

<bundles_post_ra>
// kernel: tpu_custom_call.1
= control target key start
LH: loop header
LB: loop body
LE: loop exit
PB: predicated region body
PF: predicated region fallthrough
CT: control target
= control target key end

     0   :  { %11 = vsyncpa [#allocation3], 0  ;;  %s878_s0 = inlined_call_operand.hbm [shape: f32[8,16], index: 0, kind: input, shape index: {}]   ;;  %s879_s1 = inlined_call_operand.hbm [shape: bf16[16,128], index: 1, kind: input, shape index: {}]   ;;  %s880_s2 = inlined_call_operand.hbm [shape: bf16[2,128,128], index: 2, kind: input, shape index: {}]   ;;  %s881_s3 = inlined_call_operand.hbm [shape: bf16[128,128], index: 3, kind: input, shape index: {}]   ;;  %s882_s4 = inlined_call_operand.vmem [shape: f32[3,128], index: 4, kind: input, shape index: {}]   ;;  %s883_s5 = inlined_call_operand.vmem [shape: f32[1,128], index: 5, kind: input, shape index: {}]   ;;  %s884_s6 = inlined_call_operand.hbm [shape: f32[8,128], index: 6, kind: output, shape index: {}]  }
   0x1   :  { %12 = vsyncpa [#allocation6], 0 }
   0x2   :  { %13 = vsyncpa [#allocation9], 0 }
   0x3   :  { %14 = vsyncpa [#allocation4], 0  ;;  %s765_s21 = smov [#allocation5]  }
   0x4   :  { %s30_s22 = sshll.u32 %s765_s21, 4  ;;  %s31_s22 = int_to_ptr.vmem [resolvable:$true] %s30_s22 }
   0x5   :  { %s665_s23 = scalar_lea.vmem %s31_s22, 128  ;;  %p670_p1 = scmp.lt.s32.totalorder %s31_s22, %s31_s22 }
   0x6   :  { %p666_p0 = scmp.ne.s32.totalorder %s31_s22, %s665_s23  ;;  %p671_p2 = scmp.lt.s32.totalorder %s665_s23, %s665_s23 }
   0x8   :  { %p672_p3 = por %p671_p2, %p670_p1 }
   0xa   :  { %p673_p4 = pnand %p672_p3, %p666_p0 }
   0xc   :  { %676 = shalt.err (!%p673_p4)
}
   0xd   :  { %s766_s24 = smov 64   ;;  %s767_s25 = smov 4  }
   0xe   :  { %36 = dma.hbm_to_vmem [thread:$0]  %s879_s1, 128, %s31_s22, [#allocation6], %s766_s24, %s766_s24, %s767_s25  }
   0xf   :  { %s768_s28 = smov [#allocation2]   ;;  %s769_s30 = smov [#allocation7]  }
  0x10   :  { %s21_s29 = sshll.u32 %s768_s28, 4  ;;  %s42_s7 = sshll.u32 %s769_s30, 4  ;;  %s22_s29 = int_to_ptr.vmem [resolvable:$true] %s21_s29  ;;  %s43_s7 = int_to_ptr.vmem [resolvable:$true] %s42_s7 }
  0x11   :  { %s685_s8 = scalar_lea.vmem %s22_s29, 128  ;;  %p690_p6 = scmp.lt.s32.totalorder %s22_s29, %s22_s29 }
  0x12   :  { %p686_p5 = scmp.ne.s32.totalorder %s22_s29, %s685_s8  ;;  %p691_p7 = scmp.lt.s32.totalorder %s685_s8, %s685_s8 }
  0x14   :  { %p692_p8 = por %p691_p7, %p690_p6 }
  0x16   :  { %p693_p9 = pnand %p692_p8, %p686_p5 }
  0x18   :  { %696 = shalt.err (!%p693_p9)
}
  0x19   :  { %24 = dma.hbm_to_vmem [thread:$0]  %s878_s0, 128, %s22_s29, [#allocation3]  }
  0x1a   :  { %s705_s11 = scalar_lea.vmem %s43_s7, 2048  ;;  %p710_p11 = scmp.lt.s32.totalorder %s43_s7, %s43_s7 }
  0x1b   :  { %p706_p10 = scmp.ne.s32.totalorder %s43_s7, %s705_s11  ;;  %p711_p12 = scmp.lt.s32.totalorder %s705_s11, %s705_s11 }
  0x1d   :  { %p712_p13 = por %p711_p12, %p710_p11 }
  0x1f   :  { %p713_p0 = pnand %p712_p13, %p706_p10 }
  0x21   :  { %716 = shalt.err (!%p713_p0)
}
  0x22   :  { %48 = dma.hbm_to_vmem [thread:$0]  %s880_s2, 2048, %s43_s7, [#allocation6], %s766_s24, %s766_s24, %s767_s25  }
  0x23   :  { %s770_s13 = smov [#allocation8]  }
  0x24   :  { %s54_s14 = sshll.u32 %s770_s13, 4  ;;  %s55_s14 = int_to_ptr.vmem [resolvable:$true] %s54_s14 }
  0x25   :  { %s725_s15 = scalar_lea.vmem %s55_s14, 1024  ;;  %p730_p2 = scmp.lt.s32.totalorder %s55_s14, %s55_s14 }
  0x26   :  { %p726_p1 = scmp.ne.s32.totalorder %s55_s14, %s725_s15  ;;  %p731_p3 = scmp.lt.s32.totalorder %s725_s15, %s725_s15 }
  0x28   :  { %p732_p4 = por %p731_p3, %p730_p2 }
  0x2a   :  { %p733_p5 = pnand %p732_p4, %p726_p1 }
  0x2c   :  { %736 = shalt.err (!%p733_p5)
}
  0x2d   :  { %60 = dma.hbm_to_vmem [thread:$0]  %s881_s3, 1024, %s55_s14, [#allocation9], %s766_s24, %s766_s24, %s767_s25  }
  0x2e   :  { %757 = dma.done.wait [#allocation3], 128  }
  0x2f   :  { %758 = vsyncadd [#allocation3], 4294967168 }
  0x30   :  { %759 = dma.done.wait [#allocation6], 2176  }
  0x31   :  { %760 = vsyncadd [#allocation6], 4294965120 }
  0x32   :  { %761 = dma.done.wait [#allocation9], 1024  }
  0x33   :  { %762 = vsyncadd [#allocation9], 4294966272  ;;  %v771_v0 = vmov 0.0   ;;  %vm772_vm0 = vmmov 0   ;;  %v630_v1 = vld [vmem:[#allocation5] sm:$0xff]   ;;  %v78_v2 = vld [vmem:[#allocation2] sm:$0xff] }
  0x34   :  { %555 = vmatprep.subr.bf16.mxu0 %v771_v0  ;;  %557 = vmatprep.mubr.msk.bf16.mxu0 %vm772_vm0, %v771_v0  ;;  %v79_v3 = vpack.c.bf16 %v78_v2, %v78_v2  ;;  %vm93_vm1 = vcmask 130048   ;;  %v631_v4 = vld [vmem:[#allocation7 + $0x38] sm:$0xff]   ;;  %v632_v5 = vld [vmem:[#allocation7 + $0x30] sm:$0xff]   ;;  %v633_v6 = vld [vmem:[#allocation7 + $0x28] sm:$0xff]  }
  0x35   :  { %561 = vmatprep.subr.bf16.mxu1 %v771_v0  ;;  %577 = vmatprep.mubr.msk.bf16.mxu1 %vm772_vm0, %v771_v0  ;;  %v634_v7 = vld [vmem:[#allocation7 + $0x20] sm:$0xff]   ;;  %v635_v8 = vld [vmem:[#allocation7 + $0x18] sm:$0xff]   ;;  %v636_v9 = vld [vmem:[#allocation7 + $0x10] sm:$0xff]  }
  0x36   :  { %556 = vmatpush3.bf16.msra.mxu0 %v630_v1  ;;  %562 = vmatpush3.bf16.msra.mxu1 %v631_v4  ;;  %v637_v10 = vld [vmem:[#allocation7 + $0x8] sm:$0xff]   ;;  %v638_v11 = vld [vmem:[#allocation7] sm:$0xff]   ;;  %v639_v12 = vld [vmem:[#allocation7 + $0x78] sm:$0xff]  }
  0x37   :  { %581 = vmatprep.subr.bf16.mxu0 %v771_v0  ;;  %563 = vmatprep.subr.bf16.mxu1 %v771_v0  ;;  %v640_v13 = vld [vmem:[#allocation7 + $0x70] sm:$0xff]   ;;  %v641_v14 = vld [vmem:[#allocation7 + $0x68] sm:$0xff]   ;;  %v642_v15 = vld [vmem:[#allocation7 + $0x60] sm:$0xff]  }
  0x38   :  { %v643_v16 = vld [vmem:[#allocation7 + $0x58] sm:$0xff]   ;;  %v644_v17 = vld [vmem:[#allocation7 + $0x50] sm:$0xff]   ;;  %v645_v26 = vld [vmem:[#allocation7 + $0x48] sm:$0xff]  }
  0x39   :  { %558 = vmatmul.mubr.msk.bf16.vlgmr.msra.gmra.mxu0 %vm93_vm1, %v79_v3  ;;  %v496_v18 = vld [vmem:[%s882_s4] ss:$0 sm:$0xff]  ;;  %v646_v27 = vld [vmem:[#allocation7 + $0x40] sm:$0xff]   ;;  %v647_v28 = vld [vmem:[#allocation8 + $0x38] sm:$0xff]  }
  0x3a   :  { %597 = vmatprep.mubr.msk.bf16.mxu0 %vm772_vm0, %v771_v0  ;;  %564 = vmatpush3.bf16.msra.mxu1 %v632_v5  ;;  %v648_v29 = vld [vmem:[#allocation8 + $0x30] sm:$0xff]   ;;  %v649_v30 = vld [vmem:[#allocation8 + $0x28] sm:$0xff]   ;;  %v650_v31 = vld [vmem:[#allocation8 + $0x20] sm:$0xff]  }
  0x3b   :  { %565 = vmatprep.subr.bf16.mxu1 %v771_v0  ;;  %582 = vmatpush3.bf16.msra.mxu0 %v639_v12  ;;  %v499_v32 = vld [vmem:[%s882_s4 + $0x1] ss:$0 sm:$0xff]  ;;  %v651_v40 = vld [vmem:[#allocation8 + $0x18] sm:$0xff]   ;;  %v653_v42 = vld [vmem:[#allocation8 + $0x8] sm:$0xff]  }
  0x3c   :  { %583 = vmatprep.subr.bf16.mxu0 %v771_v0  ;;  %v652_v41 = vld [vmem:[#allocation8 + $0x10] sm:$0xff]   ;;  %v654_v43 = vld [vmem:[#allocation8] sm:$0xff]  }
  0x3d   :  { %v508_v44 = vld [vmem:[%s882_s4 + $0x2] ss:$0 sm:$0xff]  ;;  %v517_v56 = vld [vmem:[%s883_s5] ss:$0 sm:$0xff]  ;;  %s773_s4 = smov [#allocation10]  }
  0x3e   :  { %566 = vmatpush3.bf16.msra.mxu1 %v633_v6  ;;  %s485_s23 = sshll.u32 %s773_s4, 4  ;;  %s486_s23 = int_to_ptr.vmem [resolvable:$true] %s485_s23 }
  0x3f   :  { %567 = vmatprep.subr.bf16.mxu1 %v771_v0  ;;  %584 = vmatpush3.bf16.msra.mxu0 %v640_v13  ;;  %s737_s24 = scalar_lea.vmem %s486_s23, 128  ;;  %p742_p7 = scmp.lt.s32.totalorder %s486_s23, %s486_s23 }
  0x40   :  { %585 = vmatprep.subr.bf16.mxu0 %v771_v0  ;;  %p738_p6 = scmp.ne.s32.totalorder %s486_s23, %s737_s24  ;;  %p743_p8 = scmp.lt.s32.totalorder %s737_s24, %s737_s24 }
  0x42   :  { %568 = vmatpush3.bf16.msra.mxu1 %v634_v7  ;;  %p744_p9 = por %p743_p8, %p742_p7 }
  0x43   :  { %569 = vmatprep.subr.bf16.mxu1 %v771_v0  ;;  %586 = vmatpush3.bf16.msra.mxu0 %v641_v14 }
  0x44   :  { %587 = vmatprep.subr.bf16.mxu0 %v771_v0  ;;  %p745_p10 = pnand %p744_p9, %p738_p6 }
  0x46   :  { %570 = vmatpush3.bf16.msra.mxu1 %v635_v8 }
  0x47   :  { %571 = vmatprep.subr.bf16.mxu1 %v771_v0  ;;  %588 = vmatpush3.bf16.msra.mxu0 %v642_v15 }
  0x48   :  { %589 = vmatprep.subr.bf16.mxu0 %v771_v0 }
  0x4a   :  { %572 = vmatpush3.bf16.msra.mxu1 %v636_v9 }
  0x4b   :  { %573 = vmatprep.subr.bf16.mxu1 %v771_v0  ;;  %590 = vmatpush3.bf16.msra.mxu0 %v643_v16 }
  0x4c   :  { %591 = vmatprep.subr.bf16.mxu0 %v771_v0 }
  0x4e   :  { %574 = vmatpush3.bf16.msra.mxu1 %v637_v10 }
  0x4f   :  { %575 = vmatprep.subr.bf16.mxu1 %v771_v0  ;;  %592 = vmatpush3.bf16.msra.mxu0 %v644_v17 }
  0x50   :  { %593 = vmatprep.subr.bf16.mxu0 %v771_v0 }
  0x52   :  { %576 = vmatpush3.bf16.msra.mxu1 %v638_v11 }
  0x53   :  { %601 = vmatprep.subr.bf16.mxu1 %v771_v0  ;;  %594 = vmatpush3.bf16.msra.mxu0 %v645_v26 }
  0x54   :  { %595 = vmatprep.subr.bf16.mxu0 %v771_v0 }
  0x57   :  { %596 = vmatpush3.bf16.msra.mxu0 %v646_v27 }
  0xf9   :  { %v131_v19 = vpop.f32.mrf.mxu0 }
  0xfa   :  { %v132_v20 = vadd.f32 %v496_v18, %v131_v19 }
  0xfb   :  { %v559_v21 = vpop.f32.mrf.mxu0 }
  0xfc   :  { %v137_v22 = vmax.f32 %v132_v20, 0.0 }
  0xfd   :  { %v134_v23 = vpop.f32.mrf.mxu0 }
  0xfe   :  { %v138_v24 = vpack.c.bf16 %v137_v22, %v137_v22 }
  0xff   :  { %v560_v25 = vpop.f32.mrf.mxu0 }
 0x100   :  { %578 = vmatmul.mubr.bf16.vlgmr.msra.gmra.mxu1 %v138_v24 }
 0x101   :  { %617 = vmatprep.mubr.msk.bf16.mxu1 %vm772_vm0, %v771_v0  ;;  %602 = vmatpush3.bf16.msra.mxu1 %v647_v28 }
 0x102   :  { %603 = vmatprep.subr.bf16.mxu1 %v771_v0 }
 0x105   :  { %604 = vmatpush3.bf16.msra.mxu1 %v648_v29 }
 0x106   :  { %605 = vmatprep.subr.bf16.mxu1 %v771_v0 }
 0x109   :  { %606 = vmatpush3.bf16.msra.mxu1 %v649_v30 }
 0x10a   :  { %607 = vmatprep.subr.bf16.mxu1 %v771_v0 }
 0x10d   :  { %608 = vmatpush3.bf16.msra.mxu1 %v650_v31 }
 0x10e   :  { %609 = vmatprep.subr.bf16.mxu1 %v771_v0 }
 0x111   :  { %610 = vmatpush3.bf16.msra.mxu1 %v651_v40 }
 0x112   :  { %611 = vmatprep.subr.bf16.mxu1 %v771_v0 }
 0x115   :  { %612 = vmatpush3.bf16.msra.mxu1 %v652_v41 }
 0x116   :  { %613 = vmatprep.subr.bf16.mxu1 %v771_v0 }
 0x119   :  { %614 = vmatpush3.bf16.msra.mxu1 %v653_v42 }
 0x11a   :  { %615 = vmatprep.subr.bf16.mxu1 %v771_v0 }
 0x11d   :  { %616 = vmatpush3.bf16.msra.mxu1 %v654_v43 }
 0x1c0   :  { %v242_v33 = vpop.f32.mrf.mxu1 }
 0x1c1   :  { %v243_v34 = vadd.f32 %v499_v32, %v242_v33 }
 0x1c2   :  { %v579_v35 = vpop.f32.mrf.mxu1 }
 0x1c3   :  { %v248_v36 = vmax.f32 %v243_v34, 0.0 }
 0x1c4   :  { %v245_v37 = vpop.f32.mrf.mxu1 }
 0x1c5   :  { %v249_v38 = vpack.c.bf16 %v248_v36, %v248_v36 }
 0x1c6   :  { %v580_v39 = vpop.f32.mrf.mxu1 }
 0x1c7   :  { %598 = vmatmul.mubr.bf16.vlgmr.msra.gmra.mxu0 %v249_v38 }
 0x287   :  { %v354_v45 = vpop.f32.mrf.mxu0 }
 0x288   :  { %v355_v46 = vadd.f32 %v508_v44, %v354_v45 }
 0x289   :  { %v599_v47 = vpop.f32.mrf.mxu0 }
 0x28a   :  { %v360_v48 = vadd.f32 3.0, %v355_v46 }
 0x28b   :  { %v357_v49 = vpop.f32.mrf.mxu0 }
 0x28c   :  { %v361_v50 = vmax.f32 %v360_v48, 0.0 }
 0x28d   :  { %v600_v51 = vpop.f32.mrf.mxu0 }
 0x28e   :  { %v362_v52 = vmin.f32 %v361_v50, 6.0 }
 0x290   :  { %v363_v53 = vmul.f32 %v362_v52, %v355_v46 }
 0x292   :  { %v364_v54 = vmul.f32 0.16666667, %v363_v53 }
 0x294   :  { %v365_v55 = vpack.c.bf16 %v364_v54, %v364_v54 }
 0x296   :  { %618 = vmatmul.mubr.bf16.vlgmr.msra.gmra.mxu1 %v365_v55 }
 0x356   :  { %v471_v57 = vpop.f32.mrf.mxu1 }
 0x357   :  { %v472_v58 = vadd.f32 %v517_v56, %v471_v57 }
 0x358   :  { %v619_v59 = vpop.f32.mrf.mxu1 }
 0x359   :  { %655 = vtanh.f32 %v472_v58 }
 0x35a   :  { %v474_v60 = vpop.f32.mrf.mxu1 }
 0x35c   :  { %v620_v61 = vpop.f32.mrf.mxu1 }
 0x366   :  { %v656_v62 = vpop.eup %655 }
 0x367   :  { %478 = vst [vmem:[#allocation10] sm:$0xff] %v656_v62 }
 0x368   :  { %748 = shalt.err (!%p745_p10)
}
 0x369   :  { %488 = dma.vmem_to_hbm [thread:$0]  %s486_s23, 128, %s884_s6, [#allocation4]  }
 0x36a   :  { %763 = dma.done.wait [#allocation4], 128  }
 0x36b   :  { %764 = vsyncadd [#allocation4], 4294967168 }
 0x36c   :  { %492 = vsyncpa [#allocation3], 1 }
 0x36d   :  { %493 = vsyncpa [#allocation6], 1 }
 0x36e   :  { %494 = vsyncpa [#allocation9], 1 }
 0x36f   :  { %495 = vsyncpa [#allocation4], 1 }

</bundles_post_ra>
